<compile_context>
chip_gen: v7x
topology: tpu7x:2x2x1
jax: 0.10.0
libtpu: 0.0.40
codegen_flags: <defaults>
</compile_context>

<pallas_src>
import jax
import jax.numpy as jnp
from jax.experimental import pallas as pl
from jax.experimental.pallas import tpu as pltpu

EPS = 1e-05
NEGATIVE_SLOPE = 0.01
NUM_GROUPS = 8
HIDDEN_SIZE = 256
INPUT_SIZE = 512
GROUP_SIZE = HIDDEN_SIZE // NUM_GROUPS  # 32


def _fused_kernel(x_ref, w_ref, b_ref, gw_ref, gb_ref, sel_ref, selt_ref, o_ref):
    # Linear: (TB, In) @ (In, H) + bias. Weight block is resident across batch tiles.
    x = x_ref[...]
    h = jnp.dot(x, w_ref[...], preferred_element_type=jnp.float32)
    h = h + b_ref[...]                                   # (TB, H)

    # Lane-dense GroupNorm statistics on the (otherwise idle) MXU:
    #   sel  : (H, G) one-hot group selector, selt : (G, H) its transpose.
    inv_c = jnp.float32(1.0 / GROUP_SIZE)
    sums = jnp.dot(h, sel_ref[...], preferred_element_type=jnp.float32)       # (TB, G)
    sqs = jnp.dot(h * h, sel_ref[...], preferred_element_type=jnp.float32)    # (TB, G)
    mean = sums * inv_c
    var = sqs * inv_c - mean * mean                      # biased variance, E[x^2] - E[x]^2
    rstd = jax.lax.rsqrt(var + EPS)                      # (TB, G)

    # Broadcast per-group stats back to the full hidden dim (stays 256-lane dense).
    scale = jnp.dot(rstd, selt_ref[...], preferred_element_type=jnp.float32)          # per-elem rstd
    shift = jnp.dot(mean * rstd, selt_ref[...], preferred_element_type=jnp.float32)   # per-elem mean*rstd

    # GroupNorm affine; gw/gb are pre-scaled by 2 in the wrapper (folds `x + x`).
    y = (h * scale - shift) * gw_ref[...] + gb_ref[...]
    # LeakyReLU
    o_ref[...] = jnp.where(y >= 0, y, NEGATIVE_SLOPE * y).astype(o_ref.dtype)


def fused_forward(x, fc_weight_t, fc_bias, gn_weight, gn_bias, *, block_batch=256):
    """x: (B, INPUT_SIZE); fc_weight_t: pre-transposed weight (INPUT_SIZE, HIDDEN_SIZE).

    Returns (B, HIDDEN_SIZE), matching
    F.linear -> F.group_norm(num_groups=8) -> leaky_relu(0.01) -> x + x.
    """
    B = x.shape[0]
    TB = min(block_batch, B)
    grid = (pl.cdiv(B, TB),)

    b2 = fc_bias.reshape(1, -1)
    # Fold the trailing `x + x` into the affine (LeakyReLU positive homogeneity).
    gw2 = (2.0 * gn_weight).reshape(1, -1)
    gb2 = (2.0 * gn_bias).reshape(1, -1)

    # Static one-hot group selector for MXU-based per-group reductions/broadcasts.
    gid = jnp.arange(HIDDEN_SIZE, dtype=jnp.int32) // GROUP_SIZE
    sel = (gid[:, None] == jnp.arange(NUM_GROUPS, dtype=jnp.int32)[None, :]).astype(jnp.float32)
    sel_t = sel.T

    out = pl.pallas_call(
        _fused_kernel,
        out_shape=jax.ShapeDtypeStruct((B, HIDDEN_SIZE), x.dtype),
        grid_spec=pl.GridSpec(
            grid=grid,
            in_specs=[
                pl.BlockSpec((TB, INPUT_SIZE), lambda i: (i, 0)),            # x: tiled over batch
                pl.BlockSpec((INPUT_SIZE, HIDDEN_SIZE), lambda i: (0, 0)),   # W: resident in VMEM
                pl.BlockSpec((1, HIDDEN_SIZE), lambda i: (0, 0)),            # fc bias
                pl.BlockSpec((1, HIDDEN_SIZE), lambda i: (0, 0)),            # 2*gn_weight
                pl.BlockSpec((1, HIDDEN_SIZE), lambda i: (0, 0)),            # 2*gn_bias
                pl.BlockSpec((HIDDEN_SIZE, NUM_GROUPS), lambda i: (0, 0)),   # group selector
                pl.BlockSpec((NUM_GROUPS, HIDDEN_SIZE), lambda i: (0, 0)),   # selector^T
            ],
            out_specs=pl.BlockSpec((TB, HIDDEN_SIZE), lambda i: (i, 0)),
        ),
        compiler_params=pltpu.CompilerParams(
            # Batch tiles are independent -> shard across both TensorCores on v7x.
            dimension_semantics=("parallel",),
        ),
    )(x, fc_weight_t, b2, gw2, gb2, sel, sel_t)
    return out


def reference_forward(x, fc_weight, fc_bias, gn_weight, gn_bias):
    h = x @ fc_weight.T + fc_bias
    B, H = h.shape
    hg = h.reshape(B, NUM_GROUPS, H // NUM_GROUPS)
    mean = hg.mean(axis=-1, keepdims=True)
    var = ((hg - mean) ** 2).mean(axis=-1, keepdims=True)
    norm = ((hg - mean) / jnp.sqrt(var + EPS)).reshape(B, H)
    y = norm * gn_weight + gn_bias
    y = jnp.where(y >= 0, y, NEGATIVE_SLOPE * y)
    return y + y


if __name__ == "__main__":
    key = jax.random.PRNGKey(0)
    k_x, k_w, k_b, k_gw, k_gb = jax.random.split(key, 5)

    batch = 8
    x = jax.random.normal(k_x, (batch, INPUT_SIZE), dtype=jnp.float32)

    # nn.Linear-like uniform init; GroupNorm affine ~ 1 / 0 plus noise.
    bound = 1.0 / (INPUT_SIZE ** 0.5)
    fc_weight = jax.random.uniform(k_w, (HIDDEN_SIZE, INPUT_SIZE),
                                   minval=-bound, maxval=bound, dtype=jnp.float32)
    fc_bias = jax.random.uniform(k_b, (HIDDEN_SIZE,),
                                 minval=-bound, maxval=bound, dtype=jnp.float32)
    gn_weight = 1.0 + 0.02 * jax.random.normal(k_gw, (HIDDEN_SIZE,), dtype=jnp.float32)
    gn_bias = 0.02 * jax.random.normal(k_gb, (HIDDEN_SIZE,), dtype=jnp.float32)

    # Parameter preprocessing done once (not per call): store W pre-transposed.
    fc_weight_t = jnp.asarray(fc_weight.T)  # (INPUT_SIZE, HIDDEN_SIZE)

    out = fused_forward(x, fc_weight_t, fc_bias, gn_weight, gn_bias)
    out = jax.block_until_ready(out)

    ref = reference_forward(x, fc_weight, fc_bias, gn_weight, gn_bias)
    assert out.shape == (batch, HIDDEN_SIZE)
    assert jnp.allclose(out, ref, atol=1e-4, rtol=1e-4), "mismatch vs reference"

    print("KERNEL_OK")
</pallas_src>

<mosaic_0001>
module attributes {stable_mosaic.version = 11 : i64} {
  func.func @_fused_kernel(%arg0: i32, %arg1: memref<8x512xf32, #tpu.memory_space<vmem>>, %arg2: memref<512x256xf32, #tpu.memory_space<vmem>>, %arg3: memref<1x256xf32, #tpu.memory_space<vmem>>, %arg4: memref<1x256xf32, #tpu.memory_space<vmem>>, %arg5: memref<1x256xf32, #tpu.memory_space<vmem>>, %arg6: memref<256x8xf32, #tpu.memory_space<vmem>>, %arg7: memref<8x256xf32, #tpu.memory_space<vmem>>, %arg8: memref<8x256xf32, #tpu.memory_space<vmem>>) attributes {dimension_semantics = [#tpu.dimension_semantics<parallel>], iteration_bounds = array<i64: 1>, scalar_prefetch = 0 : i64, scratch_operands = 0 : i64, tpu.core_type = #tpu.core_type<tc>, window_params = [{transform_indices = @transform_0, window_bounds = array<i64: 8, 512>}, {pipeline_mode = #tpu.pipeline_mode<synchronous>, transform_indices = @transform_1, window_bounds = array<i64: 512, 256>}, {pipeline_mode = #tpu.pipeline_mode<synchronous>, transform_indices = @transform_2, window_bounds = array<i64: 1, 256>}, {pipeline_mode = #tpu.pipeline_mode<synchronous>, transform_indices = @transform_3, window_bounds = array<i64: 1, 256>}, {pipeline_mode = #tpu.pipeline_mode<synchronous>, transform_indices = @transform_4, window_bounds = array<i64: 1, 256>}, {pipeline_mode = #tpu.pipeline_mode<synchronous>, transform_indices = @transform_5, window_bounds = array<i64: 256, 8>}, {pipeline_mode = #tpu.pipeline_mode<synchronous>, transform_indices = @transform_6, window_bounds = array<i64: 8, 256>}, {transform_indices = @transform_7, window_bounds = array<i64: 8, 256>}]} {
    %c0 = arith.constant 0 : index
    %c0_0 = arith.constant 0 : index
    %0 = vector.load %arg1[%c0, %c0_0] : memref<8x512xf32, #tpu.memory_space<vmem>>, vector<8x512xf32>
    %c0_1 = arith.constant 0 : index
    %c0_2 = arith.constant 0 : index
    %1 = vector.load %arg2[%c0_1, %c0_2] : memref<512x256xf32, #tpu.memory_space<vmem>>, vector<512x256xf32>
    %cst = arith.constant dense<0.000000e+00> : vector<8x256xf32>
    %2 = tpu.matmul %0, %1, %cst {dimension_numbers = #tpu.dot_dimension_numbers<[1], [0], [0], [1], [0, 0, 1, 1], [], []>} : vector<8x512xf32>, vector<512x256xf32>, vector<8x256xf32> -> vector<8x256xf32>
    %c0_3 = arith.constant 0 : index
    %c0_4 = arith.constant 0 : index
    %3 = vector.load %arg3[%c0_3, %c0_4] : memref<1x256xf32, #tpu.memory_space<vmem>>, vector<1x256xf32>
    %4 = vector.broadcast %3 : vector<1x256xf32> to vector<8x256xf32>
    %5 = arith.addf %2, %4 : vector<8x256xf32>
    %c0_5 = arith.constant 0 : index
    %c0_6 = arith.constant 0 : index
    %6 = vector.load %arg6[%c0_5, %c0_6] : memref<256x8xf32, #tpu.memory_space<vmem>>, vector<256x8xf32>
    %cst_7 = arith.constant dense<0.000000e+00> : vector<8x8xf32>
    %7 = tpu.matmul %5, %6, %cst_7 {dimension_numbers = #tpu.dot_dimension_numbers<[1], [0], [0], [1], [0, 0, 1, 1], [], []>} : vector<8x256xf32>, vector<256x8xf32>, vector<8x8xf32> -> vector<8x8xf32>
    %8 = arith.mulf %5, %5 : vector<8x256xf32>
    %c0_8 = arith.constant 0 : index
    %c0_9 = arith.constant 0 : index
    %9 = vector.load %arg6[%c0_8, %c0_9] : memref<256x8xf32, #tpu.memory_space<vmem>>, vector<256x8xf32>
    %cst_10 = arith.constant dense<0.000000e+00> : vector<8x8xf32>
    %10 = tpu.matmul %8, %9, %cst_10 {dimension_numbers = #tpu.dot_dimension_numbers<[1], [0], [0], [1], [0, 0, 1, 1], [], []>} : vector<8x256xf32>, vector<256x8xf32>, vector<8x8xf32> -> vector<8x8xf32>
    %cst_11 = arith.constant 3.125000e-02 : f32
    %11 = vector.broadcast %cst_11 : f32 to vector<8x8xf32>
    %12 = arith.mulf %7, %11 : vector<8x8xf32>
    %cst_12 = arith.constant 3.125000e-02 : f32
    %13 = vector.broadcast %cst_12 : f32 to vector<8x8xf32>
    %14 = arith.mulf %10, %13 : vector<8x8xf32>
    %15 = arith.mulf %12, %12 : vector<8x8xf32>
    %16 = arith.subf %14, %15 : vector<8x8xf32>
    %cst_13 = arith.constant 9.99999974E-6 : f32
    %17 = vector.broadcast %cst_13 : f32 to vector<8x8xf32>
    %18 = arith.addf %16, %17 : vector<8x8xf32>
    %19 = math.rsqrt %18 : vector<8x8xf32>
    %c0_14 = arith.constant 0 : index
    %c0_15 = arith.constant 0 : index
    %20 = vector.load %arg7[%c0_14, %c0_15] : memref<8x256xf32, #tpu.memory_space<vmem>>, vector<8x256xf32>
    %cst_16 = arith.constant dense<0.000000e+00> : vector<8x256xf32>
    %21 = tpu.matmul %19, %20, %cst_16 {dimension_numbers = #tpu.dot_dimension_numbers<[1], [0], [0], [1], [0, 0, 1, 1], [], []>} : vector<8x8xf32>, vector<8x256xf32>, vector<8x256xf32> -> vector<8x256xf32>
    %22 = arith.mulf %12, %19 : vector<8x8xf32>
    %c0_17 = arith.constant 0 : index
    %c0_18 = arith.constant 0 : index
    %23 = vector.load %arg7[%c0_17, %c0_18] : memref<8x256xf32, #tpu.memory_space<vmem>>, vector<8x256xf32>
    %cst_19 = arith.constant dense<0.000000e+00> : vector<8x256xf32>
    %24 = tpu.matmul %22, %23, %cst_19 {dimension_numbers = #tpu.dot_dimension_numbers<[1], [0], [0], [1], [0, 0, 1, 1], [], []>} : vector<8x8xf32>, vector<8x256xf32>, vector<8x256xf32> -> vector<8x256xf32>
    %25 = arith.mulf %5, %21 : vector<8x256xf32>
    %26 = arith.subf %25, %24 : vector<8x256xf32>
    %c0_20 = arith.constant 0 : index
    %c0_21 = arith.constant 0 : index
    %27 = vector.load %arg4[%c0_20, %c0_21] : memref<1x256xf32, #tpu.memory_space<vmem>>, vector<1x256xf32>
    %28 = vector.broadcast %27 : vector<1x256xf32> to vector<8x256xf32>
    %29 = arith.mulf %26, %28 : vector<8x256xf32>
    %c0_22 = arith.constant 0 : index
    %c0_23 = arith.constant 0 : index
    %30 = vector.load %arg5[%c0_22, %c0_23] : memref<1x256xf32, #tpu.memory_space<vmem>>, vector<1x256xf32>
    %31 = vector.broadcast %30 : vector<1x256xf32> to vector<8x256xf32>
    %32 = arith.addf %29, %31 : vector<8x256xf32>
    %cst_24 = arith.constant 0.000000e+00 : f32
    %33 = vector.broadcast %cst_24 : f32 to vector<8x256xf32>
    %34 = arith.cmpf oge, %32, %33 : vector<8x256xf32>
    %cst_25 = arith.constant 0.00999999977 : f32
    %35 = vector.broadcast %cst_25 : f32 to vector<8x256xf32>
    %36 = arith.mulf %35, %32 : vector<8x256xf32>
    %37 = arith.select %34, %32, %36 : vector<8x256xi1>, vector<8x256xf32>
    %c0_26 = arith.constant 0 : index
    %c0_27 = arith.constant 0 : index
    %38 = vector.load %arg8[%c0_26, %c0_27] : memref<8x256xf32, #tpu.memory_space<vmem>>, vector<8x256xf32>
    tpu.vector_store %arg8[%c0_26, %c0_27], %37 {strides = array<i32>} : memref<8x256xf32, #tpu.memory_space<vmem>>, vector<8x256xf32>,
    return
  }
  func.func @transform_0(%arg0: i32) -> (i32, i32) {
    %c0_i32 = arith.constant 0 : i32
    %c0_i32_0 = arith.constant 0 : i32
    return %arg0, %c0_i32 : i32, i32
  }
  func.func @transform_1(%arg0: i32) -> (i32, i32) {
    %c0_i32 = arith.constant 0 : i32
    %c0_i32_0 = arith.constant 0 : i32
    %c0_i32_1 = arith.constant 0 : i32
    return %c0_i32, %c0_i32_0 : i32, i32
  }
  func.func @transform_2(%arg0: i32) -> (i32, i32) {
    %c0_i32 = arith.constant 0 : i32
    %c0_i32_0 = arith.constant 0 : i32
    %c0_i32_1 = arith.constant 0 : i32
    return %c0_i32, %c0_i32_0 : i32, i32
  }
  func.func @transform_3(%arg0: i32) -> (i32, i32) {
    %c0_i32 = arith.constant 0 : i32
    %c0_i32_0 = arith.constant 0 : i32
    %c0_i32_1 = arith.constant 0 : i32
    return %c0_i32, %c0_i32_0 : i32, i32
  }
  func.func @transform_4(%arg0: i32) -> (i32, i32) {
    %c0_i32 = arith.constant 0 : i32
    %c0_i32_0 = arith.constant 0 : i32
    %c0_i32_1 = arith.constant 0 : i32
    return %c0_i32, %c0_i32_0 : i32, i32
  }
  func.func @transform_5(%arg0: i32) -> (i32, i32) {
    %c0_i32 = arith.constant 0 : i32
    %c0_i32_0 = arith.constant 0 : i32
    %c0_i32_1 = arith.constant 0 : i32
    return %c0_i32, %c0_i32_0 : i32, i32
  }
  func.func @transform_6(%arg0: i32) -> (i32, i32) {
    %c0_i32 = arith.constant 0 : i32
    %c0_i32_0 = arith.constant 0 : i32
    %c0_i32_1 = arith.constant 0 : i32
    return %c0_i32, %c0_i32_0 : i32, i32
  }
  func.func @transform_7(%arg0: i32) -> (i32, i32) {
    %c0_i32 = arith.constant 0 : i32
    %c0_i32_0 = arith.constant 0 : i32
    return %arg0, %c0_i32 : i32, i32
  }
}

</mosaic_0001>

<bundles_post_ra>
// kernel: tpu_custom_call.1
= control target key start
LH: loop header
LB: loop body
LE: loop exit
PB: predicated region body
PF: predicated region fallthrough
CT: control target
= control target key end

     0   :  { %12 = vsyncpa [#allocation3], 0  ;;  %s1295_s0 = inlined_call_operand.vmem [shape: f32[8,512], index: 0, kind: input, shape index: {}]   ;;  %s1296_s1 = inlined_call_operand.hbm [shape: f32[512,256], index: 1, kind: input, shape index: {}]   ;;  %s1297_s2 = inlined_call_operand.vmem [shape: f32[1,256], index: 2, kind: input, shape index: {}]   ;;  %s1298_s3 = inlined_call_operand.vmem [shape: f32[1,256], index: 3, kind: input, shape index: {}]   ;;  %s1299_s4 = inlined_call_operand.vmem [shape: f32[1,256], index: 4, kind: input, shape index: {}]   ;;  %s1300_s5 = inlined_call_operand.vmem [shape: f32[256,8], index: 5, kind: input, shape index: {}]   ;;  %s1301_s6 = inlined_call_operand.vmem [shape: f32[8,256], index: 6, kind: input, shape index: {}]   ;;  %s1302_s7 = inlined_call_operand.hbm [shape: f32[8,256], index: 7, kind: output, shape index: {}]  }
   0x1   :  { %13 = vsyncpa [#allocation4], 0  ;;  %s1037_s24 = smov [#allocation2]   ;;  %s989_s28 = scalar_lea.hbm %s1296_s1, 16384 }
   0x2   :  { %s21_s25 = sshll.u32 %s1037_s24, 4  ;;  %p990_p0 = scmp.ne.s32.totalorder %s1296_s1, %s989_s28  ;;  %s22_s25 = int_to_ptr.vmem [resolvable:$true] %s21_s25 }
   0x3   :  { %p993_p1 = scmp.lt.u32.totalorder %s989_s28, %s1296_s1 }
   0x5   :  { %p995_p2 = pnand %p993_p1, %p990_p0 }
   0x7   :  { %998 = shalt.err (!%p995_p2)
}
   0x8   :  { %s999_s10 = scalar_lea.vmem %s22_s25, 16384  ;;  %p1004_p4 = scmp.lt.s32.totalorder %s22_s25, %s22_s25 }
   0x9   :  { %p1000_p3 = scmp.ne.s32.totalorder %s22_s25, %s999_s10  ;;  %p1005_p5 = scmp.lt.s32.totalorder %s999_s10, %s999_s10 }
   0xb   :  { %p1006_p6 = por %p1005_p5, %p1004_p4 }
   0xd   :  { %p1007_p7 = pnand %p1006_p6, %p1000_p3 }
   0xf   :  { %1010 = shalt.err (!%p1007_p7)
}
  0x10   :  { %s1038_s11 = smov 256   ;;  %s1039_s12 = smov 16  }
  0x11   :  { %27 = dma.hbm_to_vmem [thread:$0]  %s1296_s1, 16384, %s22_s25, [#allocation3], %s1038_s11, %s1038_s11, %s1039_s12  }
  0x12   :  { %1033 = dma.done.wait [#allocation3], 16384  }
  0x13   :  { %1034 = vsyncadd [#allocation3], 4294950912  ;;  %v46_v0 = vld [vmem:[#allocation2 + $0x8] sm:$0xff]  ;;  %v48_v1 = vld [vmem:[#allocation2 + $0x18] sm:$0xff]  ;;  %vm509_vm0 = vcmask 64512  }
  0x14   :  { %v45_v2 = vld [vmem:[#allocation2] sm:$0xff]  ;;  %v786_v3 = vpack.c.bf16 %v48_v1, %v46_v0  ;;  %v47_v4 = vld [vmem:[#allocation2 + $0x10] sm:$0xff]  ;;  %v50_v5 = vld [vmem:[#allocation2 + $0x28] sm:$0xff] }
  0x15   :  { %v52_v6 = vld [vmem:[#allocation2 + $0x38] sm:$0xff]  ;;  %v788_v7 = vpack.c.bf16 %v47_v4, %v45_v2  ;;  %v49_v9 = vld [vmem:[#allocation2 + $0x20] sm:$0xff]  ;;  %v51_v10 = vld [vmem:[#allocation2 + $0x30] sm:$0xff] }
  0x16   :  { %v790_v8 = vpack.c.bf16 %v52_v6, %v50_v5  ;;  %v54_v11 = vld [vmem:[#allocation2 + $0x48] sm:$0xff]  ;;  %787 = vmatprep.subr.bf16.mxu0 %v786_v3  ;;  %v56_v12 = vld [vmem:[#allocation2 + $0x58] sm:$0xff]  ;;  %v792_v13 = vpack.c.bf16 %v51_v10, %v49_v9  ;;  %v53_v15 = vld [vmem:[#allocation2 + $0x40] sm:$0xff] }
  0x17   :  { %789 = vmatpush1.bf16.msra.mxu0 %v788_v7  ;;  %v794_v14 = vpack.c.bf16 %v56_v12, %v54_v11  ;;  %v55_v16 = vld [vmem:[#allocation2 + $0x50] sm:$0xff]  ;;  %v58_v17 = vld [vmem:[#allocation2 + $0x68] sm:$0xff]  ;;  %v60_v18 = vld [vmem:[#allocation2 + $0x78] sm:$0xff] }
  0x18   :  { %791 = vmatprep.subr.bf16.mxu0 %v790_v8  ;;  %v796_v19 = vpack.c.bf16 %v55_v16, %v53_v15  ;;  %v798_v20 = vpack.c.bf16 %v60_v18, %v58_v17  ;;  %v57_v21 = vld [vmem:[#allocation2 + $0x60] sm:$0xff]  ;;  %v59_v22 = vld [vmem:[#allocation2 + $0x70] sm:$0xff]  ;;  %v62_v23 = vld [vmem:[#allocation2 + $0x88] sm:$0xff] }
  0x19   :  { %v64_v24 = vld [vmem:[#allocation2 + $0x98] sm:$0xff]  ;;  %v800_v25 = vpack.c.bf16 %v59_v22, %v57_v21  ;;  %v61_v27 = vld [vmem:[#allocation2 + $0x80] sm:$0xff]  ;;  %v63_v28 = vld [vmem:[#allocation2 + $0x90] sm:$0xff] }
  0x1a   :  { %v802_v26 = vpack.c.bf16 %v64_v24, %v62_v23  ;;  %v66_v29 = vld [vmem:[#allocation2 + $0xa8] sm:$0xff]  ;;  %v68_v30 = vld [vmem:[#allocation2 + $0xb8] sm:$0xff]  ;;  %v804_v31 = vpack.c.bf16 %v63_v28, %v61_v27  ;;  %v65_v33 = vld [vmem:[#allocation2 + $0xa0] sm:$0xff] }
  0x1b   :  { %793 = vmatpush1.bf16.msra.mxu0 %v792_v13  ;;  %v806_v32 = vpack.c.bf16 %v68_v30, %v66_v29  ;;  %v67_v34 = vld [vmem:[#allocation2 + $0xb0] sm:$0xff]  ;;  %v70_v35 = vld [vmem:[#allocation2 + $0xc8] sm:$0xff]  ;;  %v72_v36 = vld [vmem:[#allocation2 + $0xd8] sm:$0xff] }
  0x1c   :  { %795 = vmatprep.subr.bf16.mxu0 %v794_v14  ;;  %v808_v37 = vpack.c.bf16 %v67_v34, %v65_v33  ;;  %v810_v38 = vpack.c.bf16 %v72_v36, %v70_v35  ;;  %v69_v39 = vld [vmem:[#allocation2 + $0xc0] sm:$0xff]  ;;  %v71_v40 = vld [vmem:[#allocation2 + $0xd0] sm:$0xff]  ;;  %v42_v41 = vld [vmem:[%s1295_s0 + $0x8] sm:$0xff] }
  0x1d   :  { %v74_v42 = vld [vmem:[#allocation2 + $0xe8] sm:$0xff]  ;;  %v76_v43 = vld [vmem:[#allocation2 + $0xf8] sm:$0xff]  ;;  %249 = vmatprep.mubr.f32.mxu0 %v42_v41  ;;  %v812_v44 = vpack.c.bf16 %v71_v40, %v69_v39  ;;  %v73_v46 = vld [vmem:[#allocation2 + $0xe0] sm:$0xff] }
  0x1e   :  { %v814_v45 = vpack.c.bf16 %v76_v43, %v74_v42  ;;  %v75_v47 = vld [vmem:[#allocation2 + $0xf0] sm:$0xff]  ;;  %v78_v48 = vld [vmem:[#allocation2 + $0x108] sm:$0xff]  ;;  %v80_v49 = vld [vmem:[#allocation2 + $0x118] sm:$0xff] }
  0x1f   :  { %797 = vmatpush1.bf16.msra.mxu0 %v796_v19  ;;  %v816_v50 = vpack.c.bf16 %v75_v47, %v73_v46  ;;  %v818_v51 = vpack.c.bf16 %v80_v49, %v78_v48  ;;  %v77_v52 = vld [vmem:[#allocation2 + $0x100] sm:$0xff]  ;;  %v79_v53 = vld [vmem:[#allocation2 + $0x110] sm:$0xff]  ;;  %v82_v54 = vld [vmem:[#allocation2 + $0x128] sm:$0xff] }
  0x20   :  { %799 = vmatprep.subr.bf16.mxu0 %v798_v20  ;;  %v84_v55 = vld [vmem:[#allocation2 + $0x138] sm:$0xff]  ;;  %v820_v56 = vpack.c.bf16 %v79_v53, %v77_v52  ;;  %v81_v58 = vld [vmem:[#allocation2 + $0x120] sm:$0xff]  ;;  %v83_v59 = vld [vmem:[#allocation2 + $0x130] sm:$0xff] }
  0x21   :  { %v822_v57 = vpack.c.bf16 %v84_v55, %v82_v54  ;;  %v86_v60 = vld [vmem:[#allocation2 + $0x148] sm:$0xff]  ;;  %v88_v61 = vld [vmem:[#allocation2 + $0x158] sm:$0xff]  ;;  %v824_v62 = vpack.c.bf16 %v83_v59, %v81_v58  ;;  %v85_v0 = vld [vmem:[#allocation2 + $0x140] sm:$0xff] }
  0x22   :  { %v826_v63 = vpack.c.bf16 %v88_v61, %v86_v60  ;;  %v87_v1 = vld [vmem:[#allocation2 + $0x150] sm:$0xff]  ;;  %v90_v2 = vld [vmem:[#allocation2 + $0x168] sm:$0xff]  ;;  %v92_v3 = vld [vmem:[#allocation2 + $0x178] sm:$0xff] }
  0x23   :  { %801 = vmatpush1.bf16.msra.mxu0 %v800_v25  ;;  %v828_v4 = vpack.c.bf16 %v87_v1, %v85_v0  ;;  %v830_v5 = vpack.c.bf16 %v92_v3, %v90_v2  ;;  %v89_v6 = vld [vmem:[#allocation2 + $0x160] sm:$0xff]  ;;  %v91_v7 = vld [vmem:[#allocation2 + $0x170] sm:$0xff]  ;;  %v94_v8 = vld [vmem:[#allocation2 + $0x188] sm:$0xff] }
  0x24   :  { %803 = vmatprep.subr.bf16.mxu0 %v802_v26  ;;  %v96_v9 = vld [vmem:[#allocation2 + $0x198] sm:$0xff]  ;;  %v93_v10 = vld [vmem:[#allocation2 + $0x180] sm:$0xff]  ;;  %v95_v11 = vld [vmem:[#allocation2 + $0x190] sm:$0xff]  ;;  %v832_v12 = vpack.c.bf16 %v91_v7, %v89_v6 }
  0x25   :  { %v98_v13 = vld [vmem:[#allocation2 + $0x1a8] sm:$0xff]  ;;  %v100_v14 = vld [vmem:[#allocation2 + $0x1b8] sm:$0xff]  ;;  %v343_v15 = vld [vmem:[%s1300_s5 + $0x80] sm:$0xff]  ;;  %v834_v18 = vpack.c.bf16 %v96_v9, %v94_v8  ;;  %v836_v29 = vpack.c.bf16 %v95_v11, %v93_v10 }
  0x26   :  { %v344_v16 = vld [vmem:[%s1300_s5 + $0x88] sm:$0xff]  ;;  %v327_v17 = vld [vmem:[%s1300_s5] sm:$0xff]  ;;  %v345_v21 = vld [vmem:[%s1300_s5 + $0x90] sm:$0xff]  ;;  %v838_v33 = vpack.c.bf16 %v100_v14, %v98_v13 }
  0x27   :  { %805 = vmatpush1.bf16.msra.mxu0 %v804_v31  ;;  %v1106_v19 = vpack.c.bf16 %v344_v16, %v343_v15  ;;  %v328_v20 = vld [vmem:[%s1300_s5 + $0x8] sm:$0xff]  ;;  %v346_v22 = vld [vmem:[%s1300_s5 + $0x98] sm:$0xff]  ;;  %v329_v25 = vld [vmem:[%s1300_s5 + $0x10] sm:$0xff] }
  0x28   :  { %807 = vmatprep.subr.bf16.mxu0 %v806_v32  ;;  %v1117_v23 = vpack.c.bf16 %v328_v20, %v327_v17  ;;  %v1119_v24 = vpack.c.bf16 %v346_v22, %v345_v21  ;;  %v330_v26 = vld [vmem:[%s1300_s5 + $0x18] sm:$0xff]  ;;  %v347_v27 = vld [vmem:[%s1300_s5 + $0xa0] sm:$0xff]  ;;  %v348_v28 = vld [vmem:[%s1300_s5 + $0xa8] sm:$0xff] }
  0x29   :  { %915 = vmatprep.subr.bf16.mxu1 %v1106_v19  ;;  %v97_v30 = vld [vmem:[#allocation2 + $0x1a0] sm:$0xff]  ;;  %v99_v31 = vld [vmem:[#allocation2 + $0x1b0] sm:$0xff]  ;;  %v1135_v32 = vpack.c.bf16 %v330_v26, %v329_v25  ;;  %v102_v34 = vld [vmem:[#allocation2 + $0x1c8] sm:$0xff]  ;;  %v1138_v35 = vpack.c.bf16 %v348_v28, %v347_v27 }
  0x2a   :  { %917 = vmatpush3.bf16.msra.mxu1 %v1117_v23  ;;  %v331_v36 = vld [vmem:[%s1300_s5 + $0x20] sm:$0xff]  ;;  %v349_v39 = vld [vmem:[%s1300_s5 + $0xb0] sm:$0xff]  ;;  %v350_v40 = vld [vmem:[%s1300_s5 + $0xb8] sm:$0xff]  ;;  %v840_v41 = vpack.c.bf16 %v99_v31, %v97_v30 }
  0x2b   :  { %809 = vmatpush1.bf16.msra.mxu0 %v808_v37  ;;  %919 = vmatprep.subr.bf16.mxu1 %v1119_v24  ;;  %v332_v37 = vld [vmem:[%s1300_s5 + $0x28] sm:$0xff]  ;;  %v101_v42 = vld [vmem:[#allocation2 + $0x1c0] sm:$0xff]  ;;  %v103_v43 = vld [vmem:[#allocation2 + $0x1d0] sm:$0xff]  ;;  %v1156_v47 = vpack.c.bf16 %v350_v40, %v349_v39 }
  0x2c   :  { %811 = vmatprep.subr.bf16.mxu0 %v810_v38  ;;  %v104_v38 = vld [vmem:[#allocation2 + $0x1d8] sm:$0xff]  ;;  %v106_v46 = vld [vmem:[#allocation2 + $0x1e8] sm:$0xff]  ;;  %v333_v48 = vld [vmem:[%s1300_s5 + $0x30] sm:$0xff]  ;;  %v844_v53 = vpack.c.bf16 %v103_v43, %v101_v42 }
  0x2d   :  { %v334_v49 = vld [vmem:[%s1300_s5 + $0x38] sm:$0xff]  ;;  %v352_v52 = vld [vmem:[%s1300_s5 + $0xc8] sm:$0xff]  ;;  %v105_v54 = vld [vmem:[#allocation2 + $0x1e0] sm:$0xff] }
  0x2e   :  { %921 = vmatpush3.bf16.msra.mxu1 %v1135_v32  ;;  %v107_v55 = vld [vmem:[#allocation2 + $0x1f0] sm:$0xff]  ;;  %v110_v58 = vld [vmem:[#allocation2 + $0x208] sm:$0xff]  ;;  %v335_v60 = vld [vmem:[%s1300_s5 + $0x40] sm:$0xff] }
  0x2f   :  { %813 = vmatpush1.bf16.msra.mxu0 %v812_v44  ;;  %v1153_v44 = vpack.c.bf16 %v332_v37, %v331_v36  ;;  %923 = vmatprep.subr.bf16.mxu1 %v1138_v35  ;;  %v336_v61 = vld [vmem:[%s1300_s5 + $0x48] sm:$0xff]  ;;  %v354_v0 = vld [vmem:[%s1300_s5 + $0xd8] sm:$0xff]  ;;  %v848_v1 = vpack.c.bf16 %v107_v55, %v105_v54  ;;  %v337_v9 = vld [vmem:[%s1300_s5 + $0x50] sm:$0xff] }
  0x30   :  { %815 = vmatprep.subr.bf16.mxu0 %v814_v45  ;;  %v842_v45 = vpack.c.bf16 %v104_v38, %v102_v34  ;;  %v1189_v2 = vpack.c.bf16 %v336_v61, %v335_v60  ;;  %v114_v6 = vld [vmem:[#allocation2 + $0x228] sm:$0xff]  ;;  %v116_v8 = vld [vmem:[#allocation2 + $0x238] sm:$0xff]  ;;  %v355_v11 = vld [vmem:[%s1300_s5 + $0xe0] sm:$0xff] }
  0x31   :  { %v338_v10 = vld [vmem:[%s1300_s5 + $0x58] sm:$0xff]  ;;  %v41_v13 = vld [vmem:[%s1295_s0] sm:$0xff]  ;;  %v854_v16 = vpack.c.bf16 %v116_v8, %v114_v6  ;;  %v115_v17 = vld [vmem:[#allocation2 + $0x230] sm:$0xff] }
  0x32   :  { %925 = vmatpush3.bf16.msra.mxu1 %v1153_v44  ;;  %v113_v15 = vld [vmem:[#allocation2 + $0x220] sm:$0xff]  ;;  %v44_v20 = vld [vmem:[%s1295_s0 + $0x18] sm:$0xff]  ;;  %v1214_v21 = vpack.c.bf16 %v338_v10, %v337_v9  ;;  %v340_v27 = vld [vmem:[%s1300_s5 + $0x68] sm:$0xff] }
  0x33   :  { %817 = vmatpush1.bf16.msra.mxu0 %v816_v50  ;;  %v108_v50 = vld [vmem:[#allocation2 + $0x1f8] sm:$0xff]  ;;  %927 = vmatprep.subr.bf16.mxu1 %v1156_v47  ;;  %v339_v26 = vld [vmem:[%s1300_s5 + $0x60] sm:$0xff]  ;;  %v856_v28 = vpack.c.bf16 %v115_v17, %v113_v15  ;;  %v119_v31 = vld [vmem:[#allocation2 + $0x250] sm:$0xff] }
  0x34   :  { %819 = vmatprep.subr.bf16.mxu0 %v818_v51  ;;  %v351_v51 = vld [vmem:[%s1300_s5 + $0xc0] sm:$0xff]  ;;  %v120_v22 = vld [vmem:[#allocation2 + $0x258] sm:$0xff]  ;;  %v122_v34 = vld [vmem:[#allocation2 + $0x268] sm:$0xff] }
  0x35   :  { %v1174_v59 = vpack.c.bf16 %v352_v52, %v351_v51  ;;  %v117_v30 = vld [vmem:[#allocation2 + $0x240] sm:$0xff]  ;;  %v124_v36 = vld [vmem:[#allocation2 + $0x278] sm:$0xff]  ;;  %v123_v40 = vld [vmem:[#allocation2 + $0x270] sm:$0xff] }
  0x36   :  { %v860_v37 = vpack.c.bf16 %v119_v31, %v117_v30  ;;  %v862_v38 = vpack.c.bf16 %v124_v36, %v122_v34  ;;  %v121_v39 = vld [vmem:[#allocation2 + $0x260] sm:$0xff]  ;;  %v128_v42 = vld [vmem:[#allocation2 + $0x298] sm:$0xff]  ;;  %v131_v54 = vld [vmem:[#allocation2 + $0x2b0] sm:$0xff] }
  0x37   :  { %821 = vmatpush1.bf16.msra.mxu0 %v820_v56  ;;  %v1171_v56 = vpack.c.bf16 %v334_v49, %v333_v48  ;;  %v864_v43 = vpack.c.bf16 %v123_v40, %v121_v39  ;;  %v127_v48 = vld [vmem:[#allocation2 + $0x290] sm:$0xff]  ;;  %v130_v49 = vld [vmem:[#allocation2 + $0x2a8] sm:$0xff]  ;;  %v133_v61 = vld [vmem:[#allocation2 + $0x2c0] sm:$0xff] }
  0x38   :  { %823 = vmatprep.subr.bf16.mxu0 %v822_v57  ;;  %v846_v57 = vpack.c.bf16 %v108_v50, %v106_v46  ;;  %v125_v46 = vld [vmem:[#allocation2 + $0x280] sm:$0xff]  ;;  %v132_v50 = vld [vmem:[#allocation2 + $0x2b8] sm:$0xff]  ;;  %v134_v55 = vld [vmem:[#allocation2 + $0x2c8] sm:$0xff] }
  0x39   :  { %929 = vmatpush3.bf16.msra.mxu1 %v1171_v56  ;;  %v868_v51 = vpack.c.bf16 %v127_v48, %v125_v46  ;;  %v870_v52 = vpack.c.bf16 %v132_v50, %v130_v49  ;;  %v142_v6 = vld [vmem:[#allocation2 + $0x308] sm:$0xff]  ;;  %v144_v8 = vld [vmem:[#allocation2 + $0x318] sm:$0xff]  ;;  %v145_v17 = vld [vmem:[#allocation2 + $0x320] sm:$0xff] }
  0x3a   :  { %931 = vmatprep.subr.bf16.mxu1 %v1174_v59  ;;  %v882_v10 = vpack.c.bf16 %v144_v8, %v142_v6  ;;  %v154_v30 = vld [vmem:[#allocation2 + $0x368] sm:$0xff]  ;;  %v156_v31 = vld [vmem:[#allocation2 + $0x378] sm:$0xff]  ;;  %v357_v6 = vld [vmem:[%s1300_s5 + $0xf0] sm:$0xff] }
  0x3b   :  { %825 = vmatpush1.bf16.msra.mxu0 %v824_v62  ;;  %v112_v62 = vld [vmem:[#allocation2 + $0x218] sm:$0xff]  ;;  %v894_v36 = vpack.c.bf16 %v156_v31, %v154_v30  ;;  %v158_v39 = vld [vmem:[#allocation2 + $0x388] sm:$0xff] }
  0x3c   :  { %827 = vmatprep.subr.bf16.mxu0 %v826_v63  ;;  %v353_v63 = vld [vmem:[%s1300_s5 + $0xd0] sm:$0xff]  ;;  %v850_v3 = vpack.c.bf16 %v112_v62, %v110_v58  ;;  %v160_v40 = vld [vmem:[#allocation2 + $0x398] sm:$0xff]  ;;  %v162_v46 = vld [vmem:[#allocation2 + $0x3a8] sm:$0xff] }
  0x3d   :  { %v1192_v7 = vpack.c.bf16 %v354_v0, %v353_v63  ;;  %933 = vmatpush3.bf16.msra.mxu1 %v1189_v2  ;;  %v135_v62 = vld [vmem:[#allocation2 + $0x2d0] sm:$0xff]  ;;  %v138_v63 = vld [vmem:[#allocation2 + $0x2e8] sm:$0xff]  ;;  %v140_v0 = vld [vmem:[#allocation2 + $0x2f8] sm:$0xff] }
  0x3e   :  { %v164_v48 = vld [vmem:[#allocation2 + $0x3b8] sm:$0xff] }
  0x3f   :  { %829 = vmatpush1.bf16.msra.mxu0 %v828_v4  ;;  %v109_v4 = vld [vmem:[#allocation2 + $0x200] sm:$0xff]  ;;  %935 = vmatprep.subr.bf16.mxu1 %v1192_v7  ;;  %v902_v50 = vpack.c.bf16 %v164_v48, %v162_v46  ;;  %v358_v8 = vld [vmem:[%s1300_s5 + $0xf8] sm:$0xff] }
  0x40   :  { %831 = vmatprep.subr.bf16.mxu0 %v830_v5  ;;  %v111_v5 = vld [vmem:[#allocation2 + $0x210] sm:$0xff] }
  0x41   :  { %v852_v14 = vpack.c.bf16 %v111_v5, %v109_v4  ;;  %937 = vmatpush3.bf16.msra.mxu1 %v1214_v21  ;;  %v137_v4 = vld [vmem:[#allocation2 + $0x2e0] sm:$0xff]  ;;  %v139_v5 = vld [vmem:[#allocation2 + $0x2f0] sm:$0xff] }
  0x42   :  { %v880_v9 = vpack.c.bf16 %v139_v5, %v137_v4  ;;  %v43_v5 = vld [vmem:[%s1295_s0 + $0x10] sm:$0xff] }
  0x43   :  { %833 = vmatpush1.bf16.msra.mxu0 %v832_v12  ;;  %v356_v12 = vld [vmem:[%s1300_s5 + $0xe8] sm:$0xff] }
  0x44   :  { %835 = vmatprep.subr.bf16.mxu0 %v834_v18  ;;  %v118_v18 = vld [vmem:[#allocation2 + $0x248] sm:$0xff]  ;;  %v1216_v25 = vpack.c.bf16 %v356_v12, %v355_v11  ;;  %v141_v11 = vld [vmem:[#allocation2 + $0x300] sm:$0xff]  ;;  %v143_v12 = vld [vmem:[#allocation2 + $0x310] sm:$0xff] }
  0x45   :  { %v884_v15 = vpack.c.bf16 %v143_v12, %v141_v11  ;;  %v342_v11 = vld [vmem:[%s1300_s5 + $0x78] sm:$0xff] }
  0x46   :  { %939 = vmatprep.subr.bf16.mxu1 %v1216_v25 }
  0x47   :  { %837 = vmatpush1.bf16.msra.mxu0 %v836_v29  ;;  %v858_v29 = vpack.c.bf16 %v120_v22, %v118_v18  ;;  %v147_v18 = vld [vmem:[#allocation2 + $0x330] sm:$0xff]  ;;  %v152_v22 = vld [vmem:[#allocation2 + $0x358] sm:$0xff] }
  0x48   :  { %839 = vmatprep.subr.bf16.mxu0 %v838_v33  ;;  %v1225_v33 = vpack.c.bf16 %v340_v27, %v339_v26  ;;  %v888_v26 = vpack.c.bf16 %v147_v18, %v145_v17 }
  0x4a   :  { %941 = vmatpush3.bf16.msra.mxu1 %v1225_v33 }
  0x4b   :  { %841 = vmatpush1.bf16.msra.mxu0 %v840_v41  ;;  %v126_v41 = vld [vmem:[#allocation2 + $0x288] sm:$0xff] }
  0x4c   :  { %843 = vmatprep.subr.bf16.mxu0 %v842_v45  ;;  %v866_v45 = vpack.c.bf16 %v128_v42, %v126_v41  ;;  %v898_v42 = vpack.c.bf16 %v160_v40, %v158_v39  ;;  %v677_v39 = vld [vmem:[%s1299_s4] sm:$0x3] }
  0x4f   :  { %845 = vmatpush1.bf16.msra.mxu0 %v844_v53  ;;  %v129_v53 = vld [vmem:[#allocation2 + $0x2a0] sm:$0xff] }
  0x50   :  { %847 = vmatprep.subr.bf16.mxu0 %v846_v57  ;;  %v136_v57 = vld [vmem:[#allocation2 + $0x2d8] sm:$0xff]  ;;  %v872_v58 = vpack.c.bf16 %v131_v54, %v129_v53  ;;  %v166_v53 = vld [vmem:[#allocation2 + $0x3c8] sm:$0xff] }
  0x51   :  { %v874_v60 = vpack.c.bf16 %v136_v57, %v134_v55  ;;  %v168_v54 = vld [vmem:[#allocation2 + $0x3d8] sm:$0xff] }
  0x52   :  { %v906_v57 = vpack.c.bf16 %v168_v54, %v166_v53 }
  0x53   :  { %849 = vmatpush1.bf16.msra.mxu0 %v848_v1  ;;  %v876_v1 = vpack.c.bf16 %v135_v62, %v133_v61  ;;  %v170_v61 = vld [vmem:[#allocation2 + $0x3e8] sm:$0xff]  ;;  %v172_v62 = vld [vmem:[#allocation2 + $0x3f8] sm:$0xff] }
  0x54   :  { %851 = vmatprep.subr.bf16.mxu0 %v850_v3  ;;  %v878_v3 = vpack.c.bf16 %v140_v0, %v138_v63  ;;  %v910_v0 = vpack.c.bf16 %v172_v62, %v170_v61 }
  0x56   :  { %250 = vmatmul.mubr.f32.vlgmr.msra.gmra.mrb[0].mxu0 %v41_v13  ;;  %v146_v13 = vld [vmem:[#allocation2 + $0x328] sm:$0xff] }
  0x57   :  { %853 = vmatpush1.bf16.msra.mxu0 %v852_v14  ;;  %320 = vmatprep.mubr.f32.mxu0 %v44_v20  ;;  %v148_v14 = vld [vmem:[#allocation2 + $0x338] sm:$0xff]  ;;  %v150_v20 = vld [vmem:[#allocation2 + $0x348] sm:$0xff] }
  0x58   :  { %855 = vmatprep.subr.bf16.mxu0 %v854_v16  ;;  %v886_v16 = vpack.c.bf16 %v148_v14, %v146_v13  ;;  %v890_v27 = vpack.c.bf16 %v152_v22, %v150_v20  ;;  %v175_v13 = vlaneseq }
  0x5a   :  { %v176_v14 = vshrl.u32 %v175_v13, 7 }
  0x5b   :  { %857 = vmatpush1.bf16.msra.mxu0 %v856_v28  ;;  %v149_v28 = vld [vmem:[#allocation2 + $0x340] sm:$0xff] }
  0x5c   :  { %859 = vmatprep.subr.bf16.mxu0 %v858_v29  ;;  %v151_v29 = vld [vmem:[#allocation2 + $0x350] sm:$0xff]  ;;  %v1250_v17 = vsub.s32 0, %v176_v14 }
  0x5d   :  { %v892_v34 = vpack.c.bf16 %v151_v29, %v149_v28 }
  0x5e   :  { %v682_v48 = vrot.slane %v677_v39, %v1250_v17 }
  0x5f   :  { %861 = vmatpush1.bf16.msra.mxu0 %v860_v37  ;;  %v153_v37 = vld [vmem:[#allocation2 + $0x360] sm:$0xff] }
  0x60   :  { %863 = vmatprep.subr.bf16.mxu0 %v862_v38  ;;  %v155_v38 = vld [vmem:[#allocation2 + $0x370] sm:$0xff] }
  0x61   :  { %v896_v41 = vpack.c.bf16 %v155_v38, %v153_v37  ;;  %v663_v37 = vld [vmem:[%s1298_s3] sm:$0x3]  ;;  %s1041_s3 = smov [#allocation5]  }
  0x62   :  { %s705_s4 = sshll.u32 %s1041_s3, 4  ;;  %s706_s4 = int_to_ptr.vmem [resolvable:$true] %s705_s4 }
  0x63   :  { %865 = vmatpush1.bf16.msra.mxu0 %v864_v43  ;;  %v157_v43 = vld [vmem:[#allocation2 + $0x380] sm:$0xff]  ;;  %s1011_s20 = scalar_lea.vmem %s706_s4, 256  ;;  %p1016_p9 = scmp.lt.s32.totalorder %s706_s4, %s706_s4 }
  0x64   :  { %867 = vmatprep.subr.bf16.mxu0 %v866_v45  ;;  %v159_v45 = vld [vmem:[#allocation2 + $0x390] sm:$0xff]  ;;  %p1012_p8 = scmp.ne.s32.totalorder %s706_s4, %s1011_s20  ;;  %p1017_p10 = scmp.lt.s32.totalorder %s1011_s20, %s1011_s20 }
  0x65   :  { %v900_v49 = vpack.c.bf16 %v159_v45, %v157_v43 }
  0x66   :  { %p1018_p11 = por %p1017_p10, %p1016_p9 }
  0x67   :  { %869 = vmatpush1.bf16.msra.mxu0 %v868_v51  ;;  %v161_v51 = vld [vmem:[#allocation2 + $0x3a0] sm:$0xff] }
  0x68   :  { %871 = vmatprep.subr.bf16.mxu0 %v870_v52  ;;  %v163_v52 = vld [vmem:[#allocation2 + $0x3b0] sm:$0xff]  ;;  %p1019_p12 = pnand %p1018_p11, %p1012_p8 }
  0x69   :  { %v904_v55 = vpack.c.bf16 %v163_v52, %v161_v51 }
  0x6b   :  { %873 = vmatpush1.bf16.msra.mxu0 %v872_v58  ;;  %v165_v58 = vld [vmem:[#allocation2 + $0x3c0] sm:$0xff] }
  0x6c   :  { %875 = vmatprep.subr.bf16.mxu0 %v874_v60  ;;  %v167_v60 = vld [vmem:[#allocation2 + $0x3d0] sm:$0xff] }
  0x6d   :  { %v908_v63 = vpack.c.bf16 %v167_v60, %v165_v58 }
  0x6f   :  { %877 = vmatpush1.bf16.msra.mxu0 %v876_v1  ;;  %v169_v1 = vld [vmem:[#allocation2 + $0x3e0] sm:$0xff] }
  0x70   :  { %879 = vmatprep.subr.bf16.mxu0 %v878_v3  ;;  %v171_v3 = vld [vmem:[#allocation2 + $0x3f0] sm:$0xff] }
  0x71   :  { %v912_v4 = vpack.c.bf16 %v171_v3, %v169_v1 }
  0x73   :  { %881 = vmatpush1.bf16.msra.mxu0 %v880_v9  ;;  %v942_v9 = vpack.c.bf16 %v358_v8, %v357_v6 }
  0x74   :  { %883 = vmatprep.subr.bf16.mxu0 %v882_v10  ;;  %v341_v10 = vld [vmem:[%s1300_s5 + $0x70] sm:$0xff] }
  0x75   :  { %v944_v12 = vpack.c.bf16 %v342_v11, %v341_v10  ;;  %943 = vmatprep.subr.bf16.mxu1 %v942_v9 }
  0x77   :  { %885 = vmatpush1.bf16.msra.mxu0 %v884_v15  ;;  %945 = vmatpush3.bf16.msra.mxu1 %v944_v12  ;;  %v1245_v15 = vsub.s32 1, %v176_v14 }
  0x78   :  { %887 = vmatprep.subr.bf16.mxu0 %v886_v16  ;;  %947 = vmatprep.subr.bf16.mxu1 %v1106_v19  ;;  %v173_v16 = vld [vmem:[%s1297_s2] sm:$0x3] }
  0x79   :  { %v182_v18 = vrot.slane %v173_v16, %v1245_v15  ;;  %v178_v20 = vrot.slane %v173_v16, %v1250_v17  ;;  %v672_v45 = vrot.slane %v663_v37, %v1245_v15  ;;  %v686_v51 = vrot.slane %v677_v39, %v1245_v15 }
  0x7b   :  { %889 = vmatpush1.bf16.msra.mxu0 %v888_v26 }
  0x7c   :  { %891 = vmatprep.subr.bf16.mxu0 %v890_v27 }
  0x7f   :  { %893 = vmatpush1.bf16.msra.mxu0 %v892_v34 }
  0x80   :  { %895 = vmatprep.subr.bf16.mxu0 %v894_v36 }
  0x83   :  { %897 = vmatpush1.bf16.msra.mxu0 %v896_v41  ;;  %v668_v41 = vrot.slane %v663_v37, %v1250_v17 }
  0x84   :  { %899 = vmatprep.subr.bf16.mxu0 %v898_v42 }
  0x87   :  { %901 = vmatpush1.bf16.msra.mxu0 %v900_v49 }
  0x88   :  { %903 = vmatprep.subr.bf16.mxu0 %v902_v50 }
  0x8b   :  { %905 = vmatpush1.bf16.msra.mxu0 %v904_v55 }
  0x8c   :  { %907 = vmatprep.subr.bf16.mxu0 %v906_v57 }
  0x8f   :  { %909 = vmatpush1.bf16.msra.mxu0 %v908_v63 }
  0x90   :  { %911 = vmatprep.subr.bf16.mxu0 %v910_v0 }
  0x93   :  { %913 = vmatpush1.bf16.msra.mxu0 %v912_v4 }
  0x96   :  { %321 = vmatmul.mubr.f32.vlgmr.msra.gmra.mrb[0].mxu0 %v43_v5 }
 0x169   :  { %v322_v22 = vpop.f32.mrb[0].mxu0 }
 0x16a   :  { %v324_v26 = vpop.f32.mrb[1].mxu0  ;;  %v978_v28 = vadd.f32 %v322_v22, %v178_v20 }
 0x16b   :  { %v979_v27 = vadd.f32 %v324_v26, %v182_v18 }
 0x16d   :  { %423 = vmatprep.mubr.f32.mxu1 %v979_v27  ;;  %v430_v19 = vmul.f32 %v979_v27, %v979_v27 }
 0x16e   :  { %424 = vmatmul.mubr.f32.vlgmr.msra.gmra.mrb[0].mxu1 %v978_v28 }
 0x16f   :  { %949 = vmatpush3.bf16.msra.mxu1 %v1117_v23  ;;  %495 = vmatprep.mubr.f32.mxu1 %v430_v19  ;;  %v429_v23 = vmul.f32 %v978_v28, %v978_v28 }
 0x170   :  { %951 = vmatprep.subr.bf16.mxu1 %v1119_v24  ;;  %v508_v24 = vld [vmem:[%s1301_s6 + $0x8] sm:$0xff] }
 0x173   :  { %953 = vmatpush3.bf16.msra.mxu1 %v1135_v32  ;;  %v507_v32 = vld [vmem:[%s1301_s6] sm:$0xff] }
 0x174   :  { %955 = vmatprep.subr.bf16.mxu1 %v1138_v35  ;;  %v1040_v35 = vmov 0.0  }
 0x177   :  { %957 = vmatpush3.bf16.msra.mxu1 %v1153_v44 }
 0x178   :  { %959 = vmatprep.subr.bf16.mxu1 %v1156_v47 }
 0x17b   :  { %961 = vmatpush3.bf16.msra.mxu1 %v1171_v56 }
 0x17c   :  { %963 = vmatprep.subr.bf16.mxu1 %v1174_v59 }
 0x17f   :  { %965 = vmatpush3.bf16.msra.mxu1 %v1189_v2 }
 0x180   :  { %967 = vmatprep.subr.bf16.mxu1 %v1192_v7 }
 0x183   :  { %969 = vmatpush3.bf16.msra.mxu1 %v1214_v21 }
 0x184   :  { %971 = vmatprep.subr.bf16.mxu1 %v1216_v25 }
 0x187   :  { %973 = vmatpush3.bf16.msra.mxu1 %v1225_v33 }
 0x188   :  { %975 = vmatprep.subr.bf16.mxu1 %v942_v9 }
 0x18b   :  { %977 = vmatpush3.bf16.msra.mxu1 %v944_v12 }
 0x18c   :  { %513 = vmatprep.subr.mxu1 %v508_v24 }
 0x18e   :  { %496 = vmatmul.mubr.f32.vlgmr.msra.gmra.mrb[2].mxu1 %v429_v23 }
 0x18f   :  { %577 = vmatprep.mubr.f32.mxu1 %v1040_v35  ;;  %514 = vmatpush1.msra.mxu1 %v507_v32 }
 0x190   :  { %588 = vmatprep.subr.mxu1 %v508_v24 }
 0x241   :  { %v748_v44 = vpop.f32.mrb[0].mxu1 }
 0x242   :  { %v749_v47 = vpop.f32.mrb[1].mxu1 }
 0x243   :  { %v750_v56 = vadd.f32 %v749_v47, %v748_v44 }
 0x245   :  { %v501_v59 = vmul.f32 0.03125, %v750_v56 }
 0x247   :  { %v503_v25 = vmul.f32 %v501_v59, %v501_v59 }
 0x261   :  { %v783_v2 = vpop.f32.mrb[2].mxu1 }
 0x262   :  { %v784_v7 = vpop.f32.mrb[3].mxu1 }
 0x263   :  { %v785_v21 = vadd.f32 %v784_v7, %v783_v2 }
 0x265   :  { %v502_v33 = vmul.f32 0.03125, %v785_v21 }
 0x267   :  { %v504_v29 = vsub.f32 %v502_v33, %v503_v25 }
 0x269   :  { %v505_v30 = vadd.f32 1e-05, %v504_v29 }
 0x26b   :  { %987 = vrsqrt.f32 %v505_v30 }
 0x275   :  { %v988_v31 = vpop.eup %987 }
 0x276   :  { %714 = vmatmul.mubr.msk.f32.vlgmr.msra.gmra.mrb[4].mxu1 %vm509_vm0, %v988_v31  ;;  %v584_v34 = vmul.f32 %v988_v31, %v501_v59 }
 0x277   :  { %589 = vmatpush1.msra.mxu1 %v507_v32  ;;  %652 = vmatprep.mubr.f32.mxu1 %v1040_v35 }
 0x27a   :  { %715 = vmatmul.mubr.msk.f32.vlgmr.msra.gmra.mrb[6].mxu1 %vm509_vm0, %v584_v34 }
 0x349   :  { %v579_v36 = vpop.f32.mrb[4].mxu1 }
 0x34a   :  { %v581_v38 = vpop.f32.mrb[5].mxu1  ;;  %v659_v40 = vmul.f32 %v978_v28, %v579_v36 }
 0x34b   :  { %v660_v42 = vmul.f32 %v979_v27, %v581_v38 }
 0x34d   :  { %v654_v43 = vpop.f32.mrb[6].mxu1 }
 0x34e   :  { %v661_v46 = vsub.f32 %v659_v40, %v654_v43  ;;  %v656_v49 = vpop.f32.mrb[7].mxu1 }
 0x34f   :  { %v662_v50 = vsub.f32 %v660_v42, %v656_v49 }
 0x350   :  { %v675_v52 = vmul.f32 %v668_v41, %v661_v46 }
 0x351   :  { %v676_v53 = vmul.f32 %v672_v45, %v662_v50 }
 0x352   :  { %v689_v54 = vadd.f32 %v682_v48, %v675_v52 }
 0x353   :  { %v690_v55 = vadd.f32 %v686_v51, %v676_v53 }
 0x354   :  { %vm691_vm1 = vcmp.ge.f32.partialorder %v689_v54, 0.0  ;;  %v693_v57 = vmul.f32 0.01, %v689_v54 }
 0x355   :  { %vm692_vm2 = vcmp.ge.f32.partialorder %v690_v55, 0.0  ;;  %v694_v58 = vmul.f32 0.01, %v690_v55 }
 0x356   :  { %v695_v60 = vsel %vm691_vm1, %v689_v54, %v693_v57 }
 0x357   :  { %v696_v61 = vsel %vm692_vm2, %v690_v55, %v694_v58  ;;  %697 = vst [vmem:[#allocation5] sm:$0xff] %v695_v60 }
 0x358   :  { %698 = vst [vmem:[#allocation5 + $0x8] sm:$0xff] %v696_v61 }
 0x359   :  { %1022 = shalt.err (!%p1019_p12)
}
 0x35a   :  { %s1023_s23 = scalar_lea.hbm %s1302_s7, 256 }
 0x35b   :  { %p1024_p13 = scmp.ne.s32.totalorder %s1302_s7, %s1023_s23  ;;  %p1027_p0 = scmp.lt.u32.totalorder %s1023_s23, %s1302_s7 }
 0x35d   :  { %p1029_p1 = pnand %p1027_p0, %p1024_p13 }
 0x35f   :  { %1032 = shalt.err (!%p1029_p1)
}
 0x360   :  { %708 = dma.vmem_to_hbm [thread:$0]  %s706_s4, 256, %s1302_s7, [#allocation4]  }
 0x361   :  { %1035 = dma.done.wait [#allocation4], 256  }
 0x362   :  { %1036 = vsyncadd [#allocation4], 4294967040 }
 0x363   :  { %712 = vsyncpa [#allocation3], 1 }
 0x364   :  { %713 = vsyncpa [#allocation4], 1 }

</bundles_post_ra>
